<compile_context>
chip_gen: v7x
topology: tpu7x:2x2x1
jax: 0.10.0
libtpu: 0.0.40
codegen_flags: <defaults>
</compile_context>

<pallas_src>
import jax
import jax.numpy as jnp
from jax import lax
from jax.experimental import pallas as pl
from jax.experimental.pallas import tpu as pltpu

EPS = 1e-5
NUM_GROUPS = 2


def _groupnorm_kernel(x_ref, gamma_ref, beta_ref, o_ref):
    # x_ref: (Cg, H*W) slab for one (batch, group); gamma/beta: (Cg, 1).
    xf = x_ref[...].astype(jnp.float32)
    inv_n = 1.0 / float(xf.size)

    # Single-pass statistics (two independent reductions -> one traversal).
    s = jnp.sum(xf)
    sq = jnp.sum(xf * xf)
    mean = s * inv_n
    var = jnp.maximum(sq * inv_n - mean * mean, 0.0)   # biased variance, >= 0
    inv = lax.rsqrt(var + EPS)

    # Fold normalize + affine into one per-element FMA: o = x*a + b.
    a = gamma_ref[...].astype(jnp.float32) * inv        # (Cg, 1)
    b = beta_ref[...].astype(jnp.float32) - mean * a    # (Cg, 1)
    o_ref[...] = (xf * a + b).astype(o_ref.dtype)


def my_group_norm(x, gamma, beta, num_groups=NUM_GROUPS):
    """x: (N, C, H, W); gamma, beta: (C,). Returns (N, C, H, W)."""
    N, C, H, W = x.shape
    assert C % num_groups == 0
    Cg = C // num_groups
    HW = H * W

    # Lane-dense views (contiguous reshapes, no data movement).
    x_r = x.reshape(N, num_groups, Cg, HW)
    gamma_r = gamma.reshape(num_groups, Cg, 1)
    beta_r = beta.reshape(num_groups, Cg, 1)

    # Grid (G, N): gamma/beta block index depends only on the outer axis, so
    # they stay resident in VMEM across all inner batch iterations.
    grid = (num_groups, N)
    x_spec = pl.BlockSpec((None, None, Cg, HW), lambda g, n: (n, g, 0, 0))
    p_spec = pl.BlockSpec((None, Cg, 1), lambda g, n: (g, 0, 0))
    out_spec = pl.BlockSpec((None, None, Cg, HW), lambda g, n: (n, g, 0, 0))

    out = pl.pallas_call(
        _groupnorm_kernel,
        out_shape=jax.ShapeDtypeStruct((N, num_groups, Cg, HW), x.dtype),
        grid_spec=pltpu.PrefetchScalarGridSpec(
            num_scalar_prefetch=0,
            grid=grid,
            in_specs=[x_spec, p_spec, p_spec],
            out_specs=out_spec,
        ),
        compiler_params=pltpu.CompilerParams(
            dimension_semantics=("parallel", "parallel"),
        ),
    )(x_r, gamma_r, beta_r)
    return out.reshape(N, C, H, W)


def _groupnorm_ref(x, gamma, beta, num_groups=NUM_GROUPS):
    N, C, H, W = x.shape
    Cg = C // num_groups
    xf = x.astype(jnp.float32).reshape(N, num_groups, Cg * H * W)
    mean = jnp.mean(xf, axis=-1, keepdims=True)
    var = jnp.mean((xf - mean) ** 2, axis=-1, keepdims=True)
    xn = ((xf - mean) / jnp.sqrt(var + EPS)).reshape(N, C, H, W)
    return (xn * gamma.reshape(1, C, 1, 1) + beta.reshape(1, C, 1, 1)).astype(x.dtype)


if __name__ == "__main__":
    key = jax.random.PRNGKey(0)
    N, C, H, W = 2, 4, 16, 16
    x = jax.random.normal(key, (N, C, H, W), dtype=jnp.float32)

    # nn.GroupNorm(affine=True) initializes weight=1, bias=0 (deterministic).
    gamma = jnp.ones((C,), dtype=jnp.float32)
    beta = jnp.zeros((C,), dtype=jnp.float32)

    out = my_group_norm(x, gamma, beta)
    out = jax.block_until_ready(out)

    ref = _groupnorm_ref(x, gamma, beta)
    assert out.shape == (N, C, H, W)
    assert jnp.allclose(out, ref, atol=2e-5, rtol=1e-5), "mismatch vs reference"

    print("KERNEL_OK")
</pallas_src>

<mosaic_0001>
module attributes {stable_mosaic.version = 11 : i64} {
  func.func @_groupnorm_kernel(%arg0: i32, %arg1: i32, %arg2: memref<1x1x2x256xf32, #tpu.memory_space<vmem>>, %arg3: memref<1x2x1xf32, #tpu.memory_space<vmem>>, %arg4: memref<1x2x1xf32, #tpu.memory_space<vmem>>, %arg5: memref<1x1x2x256xf32, #tpu.memory_space<vmem>>) attributes {dimension_semantics = [#tpu.dimension_semantics<parallel>, #tpu.dimension_semantics<parallel>], iteration_bounds = array<i64: 2, 2>, scalar_prefetch = 0 : i64, scratch_operands = 0 : i64, tpu.core_type = #tpu.core_type<tc>, window_params = [{transform_indices = @transform_0, window_bounds = array<i64: 1, 1, 2, 256>}, {transform_indices = @transform_1, window_bounds = array<i64: 1, 2, 1>}, {transform_indices = @transform_2, window_bounds = array<i64: 1, 2, 1>}, {transform_indices = @transform_3, window_bounds = array<i64: 1, 1, 2, 256>}]} {
    %c0 = arith.constant 0 : index
    %c0_0 = arith.constant 0 : index
    %c0_1 = arith.constant 0 : index
    %c0_2 = arith.constant 0 : index
    %0 = vector.load %arg2[%c0, %c0_0, %c0_1, %c0_2] : memref<1x1x2x256xf32, #tpu.memory_space<vmem>>, vector<1x1x2x256xf32>
    %1 = vector.shape_cast %0 : vector<1x1x2x256xf32> to vector<2x256xf32>
    %2 = vector.shape_cast %1 : vector<2x256xf32> to vector<1x2x256xf32>
    %cst = arith.constant dense<0.000000e+00> : vector<1xf32>
    %3 = vector.multi_reduction <add>, %2, %cst [1, 2] : vector<1x2x256xf32> to vector<1xf32>
    %4 = vector.shape_cast %3 : vector<1xf32> to vector<1x1x1xf32>
    %5 = vector.extract %4[0, 0, 0] : f32 from vector<1x1x1xf32>
    %6 = arith.mulf %1, %1 : vector<2x256xf32>
    %7 = vector.shape_cast %6 : vector<2x256xf32> to vector<1x2x256xf32>
    %cst_3 = arith.constant dense<0.000000e+00> : vector<1xf32>
    %8 = vector.multi_reduction <add>, %7, %cst_3 [1, 2] : vector<1x2x256xf32> to vector<1xf32>
    %9 = vector.shape_cast %8 : vector<1xf32> to vector<1x1x1xf32>
    %10 = vector.extract %9[0, 0, 0] : f32 from vector<1x1x1xf32>
    %cst_4 = arith.constant 0.001953125 : f32
    %11 = arith.mulf %5, %cst_4 : f32
    %cst_5 = arith.constant 0.001953125 : f32
    %12 = arith.mulf %10, %cst_5 : f32
    %13 = arith.mulf %11, %11 : f32
    %14 = arith.subf %12, %13 : f32
    %cst_6 = arith.constant 0.000000e+00 : f32
    %15 = arith.maximumf %14, %cst_6 : f32
    %cst_7 = arith.constant 9.99999974E-6 : f32
    %16 = arith.addf %15, %cst_7 : f32
    %17 = math.rsqrt %16 : f32
    %c0_8 = arith.constant 0 : index
    %c0_9 = arith.constant 0 : index
    %c0_10 = arith.constant 0 : index
    %18 = vector.load %arg3[%c0_8, %c0_9, %c0_10] : memref<1x2x1xf32, #tpu.memory_space<vmem>>, vector<1x2x1xf32>
    %19 = vector.shape_cast %18 : vector<1x2x1xf32> to vector<2x1xf32>
    %20 = vector.broadcast %17 : f32 to vector<2x1xf32>
    %21 = arith.mulf %19, %20 : vector<2x1xf32>
    %c0_11 = arith.constant 0 : index
    %c0_12 = arith.constant 0 : index
    %c0_13 = arith.constant 0 : index
    %22 = vector.load %arg4[%c0_11, %c0_12, %c0_13] : memref<1x2x1xf32, #tpu.memory_space<vmem>>, vector<1x2x1xf32>
    %23 = vector.shape_cast %22 : vector<1x2x1xf32> to vector<2x1xf32>
    %24 = vector.broadcast %11 : f32 to vector<2x1xf32>
    %25 = arith.mulf %24, %21 : vector<2x1xf32>
    %26 = arith.subf %23, %25 : vector<2x1xf32>
    %27 = vector.broadcast %21 : vector<2x1xf32> to vector<2x256xf32>
    %28 = arith.mulf %1, %27 : vector<2x256xf32>
    %29 = vector.broadcast %26 : vector<2x1xf32> to vector<2x256xf32>
    %30 = arith.addf %28, %29 : vector<2x256xf32>
    %c0_14 = arith.constant 0 : index
    %c0_15 = arith.constant 0 : index
    %c0_16 = arith.constant 0 : index
    %c0_17 = arith.constant 0 : index
    %31 = vector.load %arg5[%c0_14, %c0_15, %c0_16, %c0_17] : memref<1x1x2x256xf32, #tpu.memory_space<vmem>>, vector<1x1x2x256xf32>
    %32 = vector.shape_cast %31 : vector<1x1x2x256xf32> to vector<2x256xf32>
    %33 = vector.shape_cast %30 : vector<2x256xf32> to vector<1x1x2x256xf32>
    tpu.vector_store %arg5[%c0_14, %c0_15, %c0_16, %c0_17], %33 {strides = array<i32>} : memref<1x1x2x256xf32, #tpu.memory_space<vmem>>, vector<1x1x2x256xf32>,
    return
  }
  func.func @transform_0(%arg0: i32, %arg1: i32) -> (i32, i32, i32, i32) {
    %c0_i32 = arith.constant 0 : i32
    %c0_i32_0 = arith.constant 0 : i32
    %c0_i32_1 = arith.constant 0 : i32
    return %arg1, %arg0, %c0_i32, %c0_i32_0 : i32, i32, i32, i32
  }
  func.func @transform_1(%arg0: i32, %arg1: i32) -> (i32, i32, i32) {
    %c0_i32 = arith.constant 0 : i32
    %c0_i32_0 = arith.constant 0 : i32
    %c0_i32_1 = arith.constant 0 : i32
    return %arg0, %c0_i32, %c0_i32_0 : i32, i32, i32
  }
  func.func @transform_2(%arg0: i32, %arg1: i32) -> (i32, i32, i32) {
    %c0_i32 = arith.constant 0 : i32
    %c0_i32_0 = arith.constant 0 : i32
    %c0_i32_1 = arith.constant 0 : i32
    return %arg0, %c0_i32, %c0_i32_0 : i32, i32, i32
  }
  func.func @transform_3(%arg0: i32, %arg1: i32) -> (i32, i32, i32, i32) {
    %c0_i32 = arith.constant 0 : i32
    %c0_i32_0 = arith.constant 0 : i32
    %c0_i32_1 = arith.constant 0 : i32
    return %arg1, %arg0, %c0_i32, %c0_i32_0 : i32, i32, i32, i32
  }
}

</mosaic_0001>

<bundles_post_ra>
// kernel: tpu_custom_call.1
= control target key start
LH: loop header
LB: loop body
LE: loop exit
PB: predicated region body
PF: predicated region fallthrough
CT: control target
= control target key end

     0   :  { %s942_s0 = inlined_call_operand.hbm [shape: f32[2,2,2,256], index: 0, kind: input, shape index: {}]   ;;  %s943_s1 = inlined_call_operand.vmem [shape: f32[2,2,1], index: 1, kind: input, shape index: {}]   ;;  %s944_s2 = inlined_call_operand.vmem [shape: f32[2,2,1], index: 2, kind: input, shape index: {}]   ;;  %s945_s3 = inlined_call_operand.hbm [shape: f32[2,2,2,256], index: 3, kind: output, shape index: {}]  }
   0x1   :  { %949 = sst [smem:[#allocation9_spill]] %s942_s0 }
   0x2   :  { %8 = vsyncpa [#allocation3], 0 }
   0x3   :  { %10 = vsyncpa [#allocation3 + $0x1], 0 }
   0x4   :  { %11 = vsyncpa [#allocation4], 0 }
   0x5   :  { %13 = vsyncpa [#allocation4 + $0x1], 0  ;;  %s726_s12 = smov 0   ;;  %s728_s13 = smov 0  }
   0x6   :  { %s730_s14 = smov 0   ;;  %s732_s15 = smov 0  }
   0x7   :  { %s734_s16 = smov 0   ;;  %s736_s17 = smov 0  }
   0x8   :  { %s738_s18 = smov 0   ;;  %s740_s19 = smov 0  }
   0x9 LB: > { %s459_s20 = sadd.s32 4294967295, %s698_s19   ;;  %s460_s21 = sadd.s32 4294967294, %s698_s19   ;;  %s698_s19 = sphi %s740_s19, %s19_s19   ;;  %s694_s18 = sphi %s738_s18, %s969_s18   ;;  %s690_s17 = sphi %s736_s17, %s968_s17   ;;  %s686_s16 = sphi %s734_s16, %s967_s16   ;;  %s682_s15 = sphi %s732_s15, %s966_s15   ;;  %s678_s14 = sphi %s730_s14, %s965_s14   ;;  %s674_s13 = sphi %s728_s13, %s964_s13   ;;  %s670_s12 = sphi %s726_s12, %s963_s12  }
   0xa   : > { %s28_s22 = sadd.s32 1, %s690_s17  ;;  %s31_s23 = sadd.s32 1, %s694_s18 }
   0xb   : > { %p29_p0 = scmp.ge.s32.totalorder %s28_s22, 2  ;;  %s40_s24 = sadd.s32 1, %s678_s14 }
   0xc   : > { %p47_p1 = scmp.ne.s32.totalorder %s678_s14, %s674_s13  ;;  %p48_p2 = scmp.eq.s32.totalorder %s698_s19, 0 }
   0xd   : > { %s971_s22 = smov (%p29_p0, %s28_s22), 0  ;;  %s973_s23 = smov (!%p29_p0, %s31_s23), %s694_s18 }
   0xe   : > { %s35_s25 = ssub.s32 %s690_s17, %s971_s22  ;;  %p779_p3 = por %p48_p2, %p47_p1 }
   0xf   : > { %p33_p4 = scmp.ge.s32.totalorder %s973_s23, 2  ;;  %p53_p5 = scmp.ne.s32.totalorder %s674_s13, %s670_s12 }
  0x10   : > { %p54_p6 = scmp.eq.s32.totalorder %s459_s20, 0  ;;  %p131_p7 = scmp.eq.s32.totalorder %s459_s20, 3 }
  0x11   : > { %s975_s23 = smov (%p33_p4, %s973_s23), 0  ;;  %p137_p10 = scmp.eq.s32.totalorder %s460_s21, 3 }
  0x12   : > { %951 = sst [smem:[#allocation8_spill]] %s975_s23  ;;  %p787_p8 = por %p54_p6, %p53_p5 }
  0x13   : > { %p791_p9 = por %p131_p7, %p47_p1  ;;  %s36_s29 = ssub.s32 %s694_s18, %s975_s23 }
  0x14   : > { %s37_s30 = sor.u32 %s36_s29, %s35_s25  ;;  %p797_p12 = por %p137_p10, %p53_p5 }
  0x15   : > { %s953_s28 = scalar_select %p791_p9, 1, 0 }
  0x16   : > { %p38_p11 = scmp.eq.s32.totalorder %s37_s30, 0  ;;  %p496_p13 = scmp.lt.s32.totalorder %s698_s19, 4 }
  0x17   : > { %s954_s4 = scalar_select %p797_p12, 1, 0 }
  0x18   : > { %s157_s5 = sand.u32 1, %s678_s14   ;;  %s464_s8 = sshll.u32 %s694_s18, 1 }
  0x19   : > { %s804_s6 = scalar_select %p38_p11, %s678_s14, %s40_s24  }
  0x1a   : > { %s463_s7 = sshll.u32 %s157_s5, 2  ;;  %s465_s9 = sshll.u32 %s690_s17, 2 }
  0x1b   : > { %s161_s10 = scalar_lea.vmem [#allocation2], %s463_s7  ;;  %s167_s20 = sadd.s32 %s465_s9, %s464_s8 }
  0x1c   : > { %s171_s11 = sshll.u32 %s161_s10, 4  ;;  %s466_s21 = sshll.u32 %s167_s20, 5  ;;  %s808_s11 = int_to_ptr.vmem [resolvable:$true] %s171_s11 }
  0x1d   : > { %p812_p0 = pnand %p496_p13, %p779_p3  ;;  %s956_s0 = sld [smem:[#allocation9_spill]] }
  0x1e   : > { %s158_s7 = scalar_lea.sflag [#allocation3], %s157_s5 }
  0x1f   : > { %p572_p3 = pneg %p812_p0 }
  0x23   : > { %s819_s24 = scalar_lea.hbm %s956_s0, %s466_s21  ;;  %s575_s10 = scalar_lea.hbm %s956_s0, 256 }
  0x24   : > { %s570_s8 = scalar_lea.hbm %s819_s24, 64  ;;  %p576_p7 = scmp.lt.u32.totalorder %s819_s24, %s956_s0 }
  0x25   : > { %p571_p4 = scmp.ne.s32.totalorder %s819_s24, %s570_s8  ;;  %p577_p10 = scmp.lt.u32.totalorder %s575_s10, %s570_s8 }
  0x26   : > { %p579_p13 = scmp.lt.u32.totalorder %s570_s8, %s819_s24 }
  0x27   : > { %p573_p5 = pnand %p572_p3, %p571_p4  ;;  %p578_p11 = por %p577_p10, %p576_p7 }
  0x29   : > { %p574_p6 = pneg %p573_p5  ;;  %p580_p1 = por %p579_p13, %p578_p11 }
  0x2b   : > { %p581_p2 = pnand %p580_p1, %p574_p6 }
  0x2d   : > { %584 = shalt.err (!%p581_p2)
}
  0x2e   : > { %s585_s5 = scalar_lea.vmem %s808_s11, 64  ;;  %s700_s29 = smov [#allocation2]  }
  0x2f   : > { %p586_p4 = scmp.ne.s32.totalorder %s808_s11, %s585_s5  ;;  %s590_s30 = sshll.u32 %s700_s29, 4  ;;  %s591_s30 = int_to_ptr.vmem [resolvable:$false] %s590_s30 }
  0x30   : > { %s592_s26 = scalar_lea.vmem %s591_s30, 128  ;;  %p593_p9 = scmp.lt.s32.totalorder %s808_s11, %s591_s30 }
  0x31   : > { %p588_p5 = pnand %p586_p4, %p572_p3  ;;  %p594_p7 = scmp.lt.s32.totalorder %s592_s26, %s585_s5 }
  0x33   : > { %p589_p12 = pneg %p588_p5  ;;  %p595_p10 = por %p594_p7, %p593_p9 }
  0x35   : > { %p596_p11 = pnand %p595_p10, %p589_p12 }
  0x37   : > { %599 = shalt.err (!%p596_p11)
}
  0x38   : > { %491 = dma.hbm_to_vmem [thread:$0]  (!%p812_p0), %s819_s24, 64, %s808_s11, %s158_s7  }
  0x39   : > { %p957_p1 = scmp.lt.s32.totalorder %s698_s19, 5  ;;  %p958_p2 = scmp.ge.s32.totalorder %s698_s19, 1 }
  0x3b   : > { %p191_p3 = pnand %p958_p2, %p957_p1 }
  0x3c   : > { %s853_s8 = sand.u32 (!%p191_p3), 1, %s674_s13  }
  0x3d   : > { %194 = sbr.rel (%p191_p3) target bundleno = 513 (0x201), region = 32  ;;  %s947_s9 = sshll.u32 (!%p191_p3), %s853_s8, 2 }
  0x3e   : > { %s197_s10 = scalar_lea.sflag (!%p191_p3), [#allocation3], %s853_s8  ;;  %s200_s25 = scalar_lea.vmem (!%p191_p3), [#allocation2], %s947_s9 }
  0x44   : > { %661 = dma.done.wait (%p787_p8), %s197_s10, 64  }
  0x45   : > { %663 = vsyncadd (%p787_p8), %s197_s10, 4294967232  ;;  %v244_v0 = vlaneseq  ;;  %v701_v1 = vmov 1983009808   ;;  %v866_v6 = vld [vmem:[%s200_s25] sm:$0xf]  ;;  %vm251_vm0 = vcmask 1041408  }
  0x46   : > { %v242_v2 = vunpack.c.l.s4 %v701_v1  ;;  %v264_v8 = vmul.f32 %v866_v6, %v866_v6  ;;  %v702_v28 = vmov 0   ;;  %s703_s5 = smov 0.0   ;;  %p231_p8 = scmp.lt.s32.totalorder %s686_s16, 1  ;;  %v704_v42 = vmov 269488144  }
  0x47   : > { %v863_v3 = vshrl.u32 %v244_v0, 7  ;;  %566 = vset.pattern.permute.xlu1 %v702_v28  ;;  %567 = vset.pattern.permute.xlu0 %v702_v28  ;;  %v309_v43 = vunpack.c.l.s4 %v704_v42  ;;  %s474_s23 = sshll.u32 %s682_s15, 2  ;;  %s332_s15 = scalar_lea.sflag [#allocation4], %s853_s8 }
  0x48   : > { %v243_v4 = vunpack.c.0.s8 %v242_v2  ;;  %s232_s26 = scalar_select %p231_p8, %s686_s16, 1 }
  0x49   : > { %v310_v44 = vunpack.c.0.s8 %v309_v43  ;;  %p960_p12 = scmp.ne.s32.totalorder %s953_s28, 0 }
  0x4a   : > { %v246_v5 = vsub.s32 %v243_v4, %v863_v3  ;;  %s470_s10 = sshll.u32 %s232_s26, 1 }
  0x4b   : > { %s234_s0 = scalar_lea.vmem %s943_s1, %s470_s10  ;;  %v313_v45 = vsub.s32 %v310_v44, %v863_v3 }
  0x4c   : > { %v247_v7 = vrot.slane %v866_v6, %v246_v5  ;;  %v272_v11 = vrot.slane %v264_v8, %v246_v5  ;;  %v297_v35 = vld [vmem:[%s234_s0] sm:$0x3]  ;;  %s473_s0 = sshll.u32 %s686_s16, 1 }
  0x4d   : > { %s344_s9 = sadd.s32 %s474_s23, %s473_s0 }
  0x4e   : > { %v248_v9 = vcombine.high %v247_v7, %v247_v7  ;;  %v252_v10 = vsel %vm251_vm0, %v247_v7, 0.0  ;;  %v273_v13 = vcombine.high %v272_v11, %v272_v11  ;;  %v276_v14 = vsel %vm251_vm0, %v272_v11, 0.0 }
  0x50   : > { %v253_v12 = vsel %vm251_vm0, %v248_v9, 0.0  ;;  %v277_v16 = vsel %vm251_vm0, %v273_v13, 0.0 }
  0x51   : > { %v254_v15 = vadd.f32 %v253_v12, %v252_v10  ;;  %v278_v17 = vadd.f32 %v277_v16, %v276_v14 }
  0x53   : > { %255 = vadd.xlane.f32.xlu0 %v254_v15 }
  0x57   : > { %279 = vadd.xlane.f32.xlu0 %v278_v17 }
  0xe0   : > { %v256_v18 = vpop.xlane.xlu0 %255 }
  0xe1   : > { %v257_v19 = vrot.slane %v256_v18, 4 }
  0xe3   : > { %v258_v20 = vadd.f32 %v257_v19, %v256_v18 }
  0xe4   : > { %v280_v21 = vpop.xlane.xlu0 %279 }
  0xe5   : > { %v259_v22 = vrot.slane %v258_v20, 2  ;;  %v281_v23 = vrot.slane %v280_v21, 4 }
  0xe7   : > { %v282_v24 = vadd.f32 %v281_v23, %v280_v21  ;;  %v260_v25 = vadd.f32 %v259_v22, %v258_v20 }
  0xe9   : > { %v283_v26 = vrot.slane %v282_v24, 2  ;;  %v261_v27 = vrot.slane %v260_v25, 1 }
  0xeb   : > { %v284_v29 = vadd.f32 %v283_v26, %v282_v24  ;;  %v262_v30 = vadd.f32 %v261_v27, %v260_v25 }
  0xed   : > { %478 = vpush %v262_v30  ;;  %v285_v31 = vrot.slane %v284_v29, 1 }
  0xef   : > { %v286_v32 = vadd.f32 %v285_v31, %v284_v29 }
  0xf1   : > { %480 = vpush %v286_v32 }
 0x11e   : > { %s479_s27 = spop %478 }
 0x11f   : > { %s288_s11 = smul.f32 0.001953125, %s479_s27 }
 0x121   : > { %s290_s24 = smul.f32 %s288_s11, %s288_s11  ;;  %v301_v38 = vstv %s288_s11  ;;  %s475_s11 = sshll.u32 %s344_s9, 5 }
 0x122   : > { %s481_s7 = spop %480  ;;  %s888_s26 = scalar_lea.hbm %s945_s3, %s475_s11 }
 0x123   : > { %s289_s20 = smul.f32 0.001953125, %s481_s7 }
 0x125   : > { %s291_s21 = ssub.f32 %s289_s20, %s290_s24  ;;  %s238_s24 = scalar_lea.vmem %s944_s2, %s470_s10 }
 0x126   : > { %v300_v39 = vld [vmem:[%s238_s24] sm:$0x3]  ;;  %s959_s20 = sshll.u32 %s853_s8, 2  ;;  %s705_s10 = smov [#allocation5]  }
 0x127   : > { %s292_s29 = smax.f32 %s703_s5, %s291_s21  ;;  %s230_s21 = scalar_lea.vmem [#allocation5], %s959_s20 }
 0x128   : > { %s293_s30 = sadd.f32 1e-05, %s292_s29  ;;  %s348_s5 = sshll.u32 %s230_s21, 4  ;;  %s890_s5 = int_to_ptr.vmem [resolvable:$true] %s348_s5 }
 0x129   : > { %s600_s16 = scalar_lea.vmem %s890_s5, 64  ;;  %s604_s25 = sshll.u32 %s705_s10, 4  ;;  %s605_s25 = int_to_ptr.vmem [resolvable:$false] %s604_s25 }
 0x12a   : > { %v294_v33 = vstv %s293_s30  ;;  %p601_p9 = scmp.ne.s32.totalorder %s890_s5, %s600_s16  ;;  %s606_s27 = scalar_lea.vmem %s605_s25, 128 }
 0x12b   : > { %568 = vrsqrt.f32 %v294_v33  ;;  %p607_p13 = scmp.lt.s32.totalorder %s890_s5, %s605_s25  ;;  %p608_p4 = scmp.lt.s32.totalorder %s606_s27, %s600_s16 }
 0x12c   : > { %p602_p0 = pnand %p601_p9, %p960_p12 }
 0x12d   : > { %p609_p5 = por %p608_p4, %p607_p13 }
 0x12e   : > { %p603_p6 = pneg %p602_p0 }
 0x130   : > { %p610_p7 = pnand %p609_p5, %p603_p6 }
 0x135   : > { %v569_v34 = vpop.eup %568 }
 0x136   : > { %482 = vpush %v569_v34 }
 0x167   : > { %s483_s7 = spop %482 }
 0x168   : > { %v298_v36 = vstv %s483_s7 }
 0x169   : > { %v299_v37 = vmul.f32 %v298_v36, %v297_v35 }
 0x16b   : > { %v302_v40 = vmul.f32 %v301_v38, %v299_v37  ;;  %306 = vperm.xlu1 %566, %v299_v37  }
 0x16d   : > { %v303_v41 = vsub.f32 %v300_v39, %v302_v40 }
 0x16f   : > { %319 = vperm.xlu1 %566, %v303_v41  }
 0x1ea   : > { %v307_v46 = vpop.permute.xlu1 %306 }
 0x1eb   : > { %v314_v47 = vrot.slane %v307_v46, %v313_v45 }
 0x1ed   : > { %v316_v49 = vmul.f32 %v314_v47, %v866_v6 }
 0x1ee   : > { %v320_v48 = vpop.permute.xlu1 %319 }
 0x1ef   : > { %v327_v50 = vrot.slane %v320_v48, %v313_v45 }
 0x1f1   : > { %v329_v51 = vadd.f32 %v327_v50, %v316_v49 }
 0x1f3   : > { %330 = vst [vmem:[%s230_s21] sm:$0xf] %v329_v51 }
 0x1f4   : > { %613 = shalt.err (!%p610_p7)
}
 0x1f5   : > { %s614_s8 = scalar_lea.hbm %s888_s26, 64  ;;  %s618_s0 = scalar_lea.hbm %s945_s3, 256 }
 0x1f6   : > { %p615_p10 = scmp.ne.s32.totalorder %s888_s26, %s614_s8  ;;  %p619_p2 = scmp.lt.u32.totalorder %s888_s26, %s945_s3 }
 0x1f7   : > { %p620_p3 = scmp.lt.u32.totalorder %s618_s0, %s614_s8  ;;  %p622_p9 = scmp.lt.u32.totalorder %s614_s8, %s888_s26 }
 0x1f8   : > { %p616_p11 = pnand %p615_p10, %p960_p12 }
 0x1f9   : > { %p621_p8 = por %p620_p3, %p619_p2 }
 0x1fa   : > { %p617_p1 = pneg %p616_p11 }
 0x1fb   : > { %p623_p0 = por %p622_p9, %p621_p8 }
 0x1fd   : > { %p624_p6 = pnand %p623_p0, %p617_p1 }
 0x1ff   : > { %627 = shalt.err (!%p624_p6)
}
 0x200   : > { %486 = dma.vmem_to_hbm [thread:$0]  (%p960_p12), %s890_s5, 64, %s888_s26, %s332_s15  }
 0x201 PF: > { %p497_p13 = scmp.ge.s32.totalorder %s698_s19, 2  ;;  %s360_s11 = sand.u32 1, %s670_s12  }
 0x202   : > { %p961_p4 = scmp.ne.s32.totalorder %s954_s4, 0  ;;  %s361_s20 = scalar_lea.sflag [#allocation4], %s360_s11 }
 0x204   : > { %p493_p5 = pnand %p497_p13, %p961_p4 }
 0x206   : > { %665 = dma.done.wait (!%p493_p5), %s361_s20, 64  }
 0x207   : > { %667 = vsyncadd (!%p493_p5), %s361_s20, 4294967232  ;;  %s19_s19 = sadd.s32 1, %s698_s19   ;;  %s962_s28 = sld [smem:[#allocation8_spill]] }
 0x208   : > { %p16_p7 = scmp.ge.s32.totalorder %s19_s19, 6   ;;  %s963_s12 = smov %s674_s13 }
 0x209   : > { %s964_s13 = smov %s678_s14  ;;  %s965_s14 = smov %s804_s6 }
 0x20a   : > { %s966_s15 = smov %s690_s17  ;;  %s967_s16 = smov %s694_s18 }
 0x20b   : > { %s968_s17 = smov %s971_s22  ;;  %18 = sbr.rel (!%p16_p7) target bundleno = 9 (0x9), region = 83 }
 0x20d   : > { %s969_s18 = smov %s962_s28 }
 0x212   :  { %366 = vsyncpa [#allocation3], 1 }
 0x213   :  { %368 = vsyncpa [#allocation3 + $0x1], 1 }
 0x214   :  { %369 = vsyncpa [#allocation4], 1 }
 0x215   :  { %371 = vsyncpa [#allocation4 + $0x1], 1 }

</bundles_post_ra>
